<compile_context>
chip_gen: v6e
topology: v6e:2x2x1
jax: 0.10.0
libtpu: 0.0.40
codegen_flags: <defaults>
</compile_context>

<pallas_src>
import jax
import jax.numpy as jnp
import numpy as np
from jax.experimental import pallas as pl
from jax.experimental.pallas import tpu as pltpu


def _round_up(x, m):
    return ((x + m - 1) // m) * m


# --------------------------------------------------------------------------- #
# Pallas kernel: fused shared-MLP + max-pool over nsample for ALL groupers
# --------------------------------------------------------------------------- #
def _make_fused_sa_kernel(tile_g, sub_g, nsamples, co_pad):
    """Kernel refs: [x_k, w1_k, b1_k, w2_k] * K, b2_all, out, acc_scratch."""
    n_groupers = len(nsamples)
    n_sub = tile_g // sub_g

    def kernel(*refs):
        b2_ref = refs[4 * n_groupers]
        o_ref = refs[4 * n_groupers + 1]
        acc_ref = refs[4 * n_groupers + 2]

        # Bound live f32 intermediates: process sub_g groups at a time.
        @pl.loop(0, n_sub)
        def _(c):
            acc_sub = None
            for k in range(n_groupers):                   # static unroll over groupers
                x_ref, w1_ref, b1_ref, w2_ref = refs[4 * k: 4 * k + 4]
                s = nsamples[k]
                row0 = pl.multiple_of(c * (sub_g * s), sub_g * s)
                x = x_ref[pl.ds(row0, sub_g * s), :]      # (sub_g*S, Cin_pad) bf16
                h = jnp.dot(x, w1_ref[...], preferred_element_type=jnp.float32)
                h = jnp.maximum(h + b1_ref[...], 0.0)     # layer-1 bias/ReLU in f32
                y = jnp.dot(h.astype(w2_ref.dtype), w2_ref[...],
                            preferred_element_type=jnp.float32)
                # Layer-2 bias + ReLU are hoisted past the max (monotone -> exact);
                # only a raw matmul + sublane max touch the S-amplified tensor.
                pooled = jnp.max(y.reshape(sub_g, s, co_pad), axis=1)
                # Each grouper's padded W2 only populates its own channel slice of
                # the 128-lane slab; other slices are exactly 0, so '+' == concat.
                acc_sub = pooled if acc_sub is None else acc_sub + pooled
            g0 = pl.multiple_of(c * sub_g, sub_g)
            acc_ref[pl.ds(g0, sub_g), :] = acc_sub

        final = jnp.maximum(acc_ref[...] + b2_ref[...], 0.0)   # (tile_g, co_pad) f32
        o_ref[...] = final.T                                    # (co_pad, tile_g) XLU transpose

    return kernel


def _choose_sub_g(tile_g, nsamples, co_pad, h_list, live_budget=2 * 1024 * 1024):
    """Largest power-of-two divisor of tile_g (multiple of 8) whose S-amplified
    f32 intermediates (h + y) stay under live_budget."""
    s_max, h_max = max(nsamples), max(h_list)
    sub = tile_g
    while (sub % 2 == 0 and (sub // 2) % 8 == 0
           and sub * s_max * (co_pad + h_max) * 4 > live_budget):
        sub //= 2
    return sub


def _vmem_estimate(tile_g, sub_g, nsamples, cin_pad, co_pad, h_list):
    s_max, h_max = max(nsamples), max(h_list)
    inp = sum(2 * tile_g * s * cin_pad * 2 for s in nsamples)   # bf16, double-buffered
    out = 2 * tile_g * co_pad * 4                               # f32 output, double-buffered
    acc = tile_g * co_pad * 4                                   # scratch accumulator
    live = 2 * sub_g * s_max * (co_pad + h_max) * 4             # f32 h + y (x2 margin)
    wts = sum(2 * ((cin_pad * h + h * co_pad) * 2 + (h + co_pad) * 4) for h in h_list)
    return inp + out + acc + live + wts


def _choose_group_tiling(npoint, batch, nsamples, cin_pad, co_pad, h_list,
                         budget_bytes=16 * 1024 * 1024):
    """Pick (tile_g, npoint_pad, n_tiles, sub_g) under an explicit VMEM budget
    (safe for v7x's 64-MiB physical / 32-MiB default-scoped VMEM).  Prefer an
    even total step count (v7x: 2 TensorCores share the 'parallel' axes), then
    the fewest grid steps (biggest tile, lane-dense output stores)."""
    np8 = _round_up(max(npoint, 8), 8)
    options = []

    def consider(tile_g, npoint_pad):
        sub_g = _choose_sub_g(tile_g, nsamples, co_pad, h_list)
        if _vmem_estimate(tile_g, sub_g, nsamples, cin_pad, co_pad, h_list) <= budget_bytes:
            options.append((tile_g, npoint_pad, npoint_pad // tile_g, sub_g))

    consider(np8, np8)                                # single tile spanning all of npoint
    for t in (512, 384, 256, 128):                    # lane-dense multi-tile candidates
        if t < np8:
            consider(t, _round_up(npoint, t))
    if not options:                                   # fallback: smallest lane-dense tile
        t = 128 if np8 > 128 else np8
        npad = _round_up(npoint, t)
        options.append((t, npad, npad // t, _choose_sub_g(t, nsamples, co_pad, h_list)))
    options.sort(key=lambda o: ((batch * o[2]) % 2 != 0, o[2], -o[0]))
    return options[0]


def fused_sa_mlp_maxpool(grouped_list, params_kernel, b2_all, npoint, *,
                         compute_dtype=jnp.bfloat16):
    """grouped_list[k]: (B, npoint, S_k, Cin_pad) f32 grouped points.
    params_kernel[k]: (w1 (Cin_pad,Hk) bf16, b1 (1,Hk) f32, w2 (Hk,Co_pad) bf16).
    b2_all: (1, Co_pad) f32 with every grouper's bias in its channel slice.
    Returns (B, Co_pad, npoint_pad) f32, channel-first."""
    B, _, _, cin_pad = grouped_list[0].shape
    nsamples = [g.shape[2] for g in grouped_list]
    h_list = [w1.shape[1] for (w1, _, _) in params_kernel]
    co_pad = b2_all.shape[1]

    tile_g, npoint_pad, n_tiles, sub_g = _choose_group_tiling(
        npoint, B, nsamples, cin_pad, co_pad, h_list)

    flat_inputs, in_specs = [], []
    for grouped, (w1, b1, w2), s in zip(grouped_list, params_kernel, nsamples):
        if npoint_pad != npoint:
            grouped = jnp.pad(grouped,
                              ((0, 0), (0, npoint_pad - npoint), (0, 0), (0, 0)))
        # (B, npoint_pad, S, Cin_pad) -> (B, npoint_pad*S, Cin_pad): free row-major
        # merge in HBM; the kernel never relayouts its input.
        x = grouped.reshape(B, npoint_pad * s, cin_pad).astype(compute_dtype)
        h = w1.shape[1]
        flat_inputs += [x, w1, b1, w2]
        in_specs += [
            pl.BlockSpec((pl.Squeezed(), tile_g * s, cin_pad), lambda b, j: (b, j, 0)),
            pl.BlockSpec((cin_pad, h), lambda b, j: (0, 0)),
            pl.BlockSpec((1, h), lambda b, j: (0, 0)),
            pl.BlockSpec((h, co_pad), lambda b, j: (0, 0)),
        ]
    flat_inputs.append(b2_all)
    in_specs.append(pl.BlockSpec((1, co_pad), lambda b, j: (0, 0)))

    kernel = _make_fused_sa_kernel(tile_g, sub_g, tuple(nsamples), co_pad)
    return pl.pallas_call(
        kernel,
        out_shape=jax.ShapeDtypeStruct((B, co_pad, npoint_pad), jnp.float32),
        grid_spec=pltpu.PrefetchScalarGridSpec(
            num_scalar_prefetch=0,
            grid=(B, n_tiles),
            in_specs=in_specs,
            out_specs=pl.BlockSpec((pl.Squeezed(), co_pad, tile_g),
                                   lambda b, j: (b, 0, j)),
            scratch_shapes=[pltpu.VMEM((tile_g, co_pad), jnp.float32)],
        ),
        compiler_params=pltpu.CompilerParams(
            dimension_semantics=("parallel", "parallel"),
            vmem_limit_bytes=32 * 1024 * 1024),
    )(*flat_inputs)


# --------------------------------------------------------------------------- #
# Plain-JAX glue: FPS, ball query, grouping (data-dependent gathers)
# --------------------------------------------------------------------------- #
def furthest_point_sample(xyz, npoint):
    """xyz: (B, N, 3) -> (B, npoint) int32; same greedy FPS as the CUDA op."""
    B, N, _ = xyz.shape

    def body(i, state):
        idxs, dists, farthest = state
        idxs = jax.lax.dynamic_update_slice(idxs, farthest[:, None], (0, i))
        centroid = jnp.take_along_axis(xyz, farthest[:, None, None], axis=1)  # (B,1,3)
        d = jnp.sum((xyz - centroid) ** 2, axis=-1)                           # (B,N)
        dists = jnp.minimum(dists, d)
        farthest = jnp.argmax(dists, axis=-1).astype(jnp.int32)
        return idxs, dists, farthest

    idxs0 = jnp.zeros((B, npoint), jnp.int32)
    dists0 = jnp.full((B, N), 1e10, jnp.float32)
    far0 = jnp.zeros((B,), jnp.int32)
    idxs, _, _ = jax.lax.fori_loop(0, npoint, body, (idxs0, dists0, far0))
    return idxs


def ball_query(radius, nsample, xyz, new_xyz):
    """First-nsample in-radius neighbor indices, (B, M, nsample) int32.
    Scatter-min first-k selection (no O(N log N) sort over the point axis).
    Empty groups fall back to point 0 (matches the CUDA op) — an out-of-radius
    point can then dominate the max-pool for empty groups; faithful, not a bug."""
    B, N, _ = xyz.shape
    M = new_xyz.shape[1]
    d2 = jnp.sum((new_xyz[:, :, None, :] - xyz[:, None, :, :]) ** 2, axis=-1)  # (B,M,N)
    within = d2 < (radius ** 2)
    rank = jnp.cumsum(within.astype(jnp.int32), axis=-1) - 1                   # in-radius rank
    slot = jnp.where(within & (rank < nsample), rank, nsample)                 # overflow slot
    point_ids = jnp.broadcast_to(jnp.arange(N, dtype=jnp.int32), (B, M, N))
    init = jnp.full((B, M, nsample + 1), N, jnp.int32)
    b_ix = jnp.arange(B, dtype=jnp.int32)[:, None, None]
    m_ix = jnp.arange(M, dtype=jnp.int32)[None, :, None]
    idx = init.at[b_ix, m_ix, slot].min(point_ids)[..., :nsample]              # (B,M,nsample)
    first = idx[..., :1]
    idx = jnp.where(idx == N, first, idx)       # short group -> pad with first hit
    idx = jnp.where(idx == N, 0, idx)           # empty group -> point 0
    return idx.astype(jnp.int32)


def _batched_gather(x, idx):
    """x: (B, N, D), idx: (B, ...) -> (B, ..., D)."""
    return jax.vmap(lambda pts, ind: pts[ind])(x, idx)


# --------------------------------------------------------------------------- #
# The SA module forward
# --------------------------------------------------------------------------- #
class PointnetSAModule:
    """Concrete instantiation of _PointnetSAModuleBase (pool_method='max_pool').
    NOTE: matmul operands are cast to bf16 (f32 MXU accumulation); a deliberate
    precision trade vs the f32 PyTorch module, validated at rtol/atol=2e-2."""

    def __init__(self, npoint, radii, nsamples, mlps, in_channels, key,
                 compute_dtype=jnp.bfloat16):
        assert len(radii) == len(nsamples) == len(mlps)
        self.npoint = npoint
        self.radii = list(radii)
        self.nsamples = list(nsamples)
        self.pool_method = "max_pool"
        self.compute_dtype = compute_dtype
        self.co_list = [m[-1] for m in mlps]
        self.co_total = sum(self.co_list)
        self.co_pad = _round_up(self.co_total, 128)

        self.cin = in_channels + 3              # grouper concats relative xyz with feats
        self.cin_pad = _round_up(self.cin, 8)   # 9 -> 16 zero-pad (wrapper side)

        self.params_ref = []                    # logical f32 weights (reference)
        self.params_kernel = []                 # Cin/Co-padded, cast weights (kernel)
        b2_all = np.zeros((1, self.co_pad), np.float32)
        off = 0
        for mlp in mlps:
            assert len(mlp) == 2, "two 1x1 conv layers per shared MLP in this demo"
            h, co = mlp
            k1, k2, key = jax.random.split(key, 3)
            w1 = 0.1 * jax.random.normal(k1, (self.cin, h), jnp.float32)
            b1 = jnp.full((1, h), 0.01, jnp.float32)
            w2 = 0.1 * jax.random.normal(k2, (h, co), jnp.float32)
            b2 = jnp.full((1, co), 0.01, jnp.float32)
            self.params_ref.append((w1, b1, w2, b2))

            # Pad Cin with zero rows; place W2/b2 columns at this grouper's channel
            # offset inside the 128-lane-padded output slab (zero columns stay 0
            # through matmul+max, so an in-kernel add == channel concat).
            w1_p = jnp.zeros((self.cin_pad, h), jnp.float32).at[:self.cin, :].set(w1)
            w2_p = jnp.zeros((h, self.co_pad), jnp.float32).at[:, off:off + co].set(w2)
            b2_all[:, off:off + co] = np.asarray(b2)

            # Guard for the add-as-concat invariant: columns outside this grouper's
            # slice must be exactly zero.
            outside = np.ones(self.co_pad, bool)
            outside[off:off + co] = False
            assert not np.asarray(w2_p)[:, outside].any(), \
                "padded W2 columns must be exactly zero (add-as-concat invariant)"

            self.params_kernel.append(
                (w1_p.astype(compute_dtype), b1, w2_p.astype(compute_dtype)))
            off += co
        assert not b2_all[:, self.co_total:].any()
        self.b2_all = jnp.asarray(b2_all)

    def __call__(self, xyz, features, new_xyz=None):
        """xyz: (B,N,3), features: (B,N,C) ->
        (new_xyz (B,npoint,3), new_features (B, sum_k mlps[k][-1], npoint))."""
        B, N, _ = xyz.shape
        if new_xyz is None:
            fps_idx = furthest_point_sample(xyz, self.npoint)          # (B, npoint)
            new_xyz = _batched_gather(xyz, fps_idx)                    # (B, npoint, 3)

        # One cin-padded point tensor [xyz | features | 0]; subtracting a
        # zero-padded centroid touches only the xyz channels.
        pts = jnp.concatenate([xyz, features], axis=-1)
        if self.cin_pad != self.cin:
            pts = jnp.pad(pts, ((0, 0), (0, 0), (0, self.cin_pad - self.cin)))
        cent = jnp.pad(new_xyz, ((0, 0), (0, 0), (0, self.cin_pad - 3)))

        grouped_list = []
        for radius, nsample in zip(self.radii, self.nsamples):
            idx = ball_query(radius, nsample, xyz, new_xyz)            # (B, npoint, S)
            s_pad = _round_up(nsample, 8)                              # sublane-align S
            if s_pad != nsample:
                pad = jnp.broadcast_to(idx[..., :1],
                                       idx.shape[:-1] + (s_pad - nsample,))
                idx = jnp.concatenate([idx, pad], axis=-1)             # dup -> max unchanged
            grouped = _batched_gather(pts, idx) - cent[:, :, None, :]  # (B, npoint, S, Cin_pad)
            grouped_list.append(grouped)

        out = fused_sa_mlp_maxpool(grouped_list, self.params_kernel, self.b2_all,
                                   self.npoint, compute_dtype=self.compute_dtype)
        # Channel-first output directly from the kernel; only slice off padding.
        return new_xyz, out[:, :self.co_total, :self.npoint]


# Pure-JAX reference of the whole forward (same grouping code; dots use the same
# bf16-operand / f32-accumulate contract as the kernel).
def _ref_forward(module, xyz, features, new_xyz=None):
    if new_xyz is None:
        fps_idx = furthest_point_sample(xyz, module.npoint)
        new_xyz = _batched_gather(xyz, fps_idx)
    cd = module.compute_dtype
    outs = []
    for radius, nsample, (w1, b1, w2, b2) in zip(module.radii, module.nsamples,
                                                 module.params_ref):
        idx = ball_query(radius, nsample, xyz, new_xyz)
        g_xyz = _batched_gather(xyz, idx) - new_xyz[:, :, None, :]
        grouped = jnp.concatenate([g_xyz, _batched_gather(features, idx)], axis=-1)
        x = grouped.astype(cd)
        h = jnp.maximum(jnp.dot(x, w1.astype(cd),
                                preferred_element_type=jnp.float32) + b1, 0.0)
        y = jnp.maximum(jnp.dot(h.astype(cd), w2.astype(cd),
                                preferred_element_type=jnp.float32) + b2, 0.0)
        outs.append(jnp.max(y, axis=2))                                # (B, npoint, Co_k)
    out = jnp.concatenate(outs, axis=-1)
    return new_xyz, jnp.transpose(out, (0, 2, 1))


if __name__ == "__main__":
    key = jax.random.PRNGKey(0)
    kx, kf, kp = jax.random.split(key, 3)

    B, N, C = 2, 64, 6
    npoint = 16
    xyz = jax.random.uniform(kx, (B, N, 3), jnp.float32)               # (2, 64, 3)
    features = jax.random.normal(kf, (B, N, C), jnp.float32)           # (2, 64, 6)

    module = PointnetSAModule(
        npoint=npoint,
        radii=[0.2, 0.4],
        nsamples=[8, 16],
        mlps=[[16, 32], [16, 64]],
        in_channels=C,
        key=kp,
    )

    fwd = jax.jit(lambda x, f: module(x, f))
    new_xyz, new_features = fwd(xyz, features)
    jax.block_until_ready((new_xyz, new_features))

    assert new_xyz.shape == (B, npoint, 3)
    assert new_features.shape == (B, 32 + 64, npoint)

    # Silent numerical check: Pallas path vs pure-JAX reference of the full forward.
    ref_xyz, ref_features = _ref_forward(module, xyz, features)
    np.testing.assert_allclose(np.asarray(new_xyz), np.asarray(ref_xyz),
                               rtol=1e-6, atol=1e-6)
    np.testing.assert_allclose(np.asarray(new_features), np.asarray(ref_features),
                               rtol=2e-2, atol=2e-2)

    print("KERNEL_OK")
</pallas_src>

<mosaic_0001>
module attributes {stable_mosaic.version = 11 : i64} {
  func.func private @main(%arg0: i32) attributes {dimension_semantics = [#tpu.dimension_semantics<core_parallel>], iteration_bounds = array<i64: 2>, tpu.core_type = #tpu.core_type<sc_scalar_subcore>, window_params = []} {
    return
  }
}

module attributes {stable_mosaic.version = 11 : i64} {
  func.func private @main(%arg0: i32) attributes {dimension_semantics = [#tpu.dimension_semantics<core_parallel>], iteration_bounds = array<i64: 2>, tpu.core_type = #tpu.core_type<sc_scalar_subcore>, window_params = []} {
    return
  }
}

module attributes {stable_mosaic.version = 11 : i64} {
  func.func @kernel(%arg0: i32, %arg1: i32, %arg2: memref<1x128x16xbf16, #tpu.memory_space<vmem>>, %arg3: memref<16x16xbf16, #tpu.memory_space<vmem>>, %arg4: memref<1x16xf32, #tpu.memory_space<vmem>>, %arg5: memref<16x128xbf16, #tpu.memory_space<vmem>>, %arg6: memref<1x256x16xbf16, #tpu.memory_space<vmem>>, %arg7: memref<16x16xbf16, #tpu.memory_space<vmem>>, %arg8: memref<1x16xf32, #tpu.memory_space<vmem>>, %arg9: memref<16x128xbf16, #tpu.memory_space<vmem>>, %arg10: memref<1x128xf32, #tpu.memory_space<vmem>>, %arg11: memref<1x128x16xf32, #tpu.memory_space<vmem>>, %arg12: memref<16x128xf32, #tpu.memory_space<vmem>>) attributes {dimension_semantics = [#tpu.dimension_semantics<parallel>, #tpu.dimension_semantics<parallel>], iteration_bounds = array<i64: 2, 1>, scalar_prefetch = 0 : i64, scratch_operands = 1 : i64, tpu.core_type = #tpu.core_type<tc>, window_params = [{transform_indices = @transform_0, window_bounds = array<i64: 1, 128, 16>}, {pipeline_mode = #tpu.pipeline_mode<synchronous>, transform_indices = @transform_1, window_bounds = array<i64: 16, 16>}, {pipeline_mode = #tpu.pipeline_mode<synchronous>, transform_indices = @transform_2, window_bounds = array<i64: 1, 16>}, {pipeline_mode = #tpu.pipeline_mode<synchronous>, transform_indices = @transform_3, window_bounds = array<i64: 16, 128>}, {transform_indices = @transform_4, window_bounds = array<i64: 1, 256, 16>}, {pipeline_mode = #tpu.pipeline_mode<synchronous>, transform_indices = @transform_5, window_bounds = array<i64: 16, 16>}, {pipeline_mode = #tpu.pipeline_mode<synchronous>, transform_indices = @transform_6, window_bounds = array<i64: 1, 16>}, {pipeline_mode = #tpu.pipeline_mode<synchronous>, transform_indices = @transform_7, window_bounds = array<i64: 16, 128>}, {pipeline_mode = #tpu.pipeline_mode<synchronous>, transform_indices = @transform_8, window_bounds = array<i64: 1, 128>}, {transform_indices = @transform_9, window_bounds = array<i64: 1, 128, 16>}]} {
    %c0_i32 = arith.constant 0 : i32
    %c1_i32 = arith.constant 1 : i32
    %0 = arith.muli %c0_i32, %c1_i32 : i32
    %c0_i32_0 = arith.constant 0 : i32
    %1 = arith.addi %c0_i32_0, %0 : i32
    %c128_i32 = arith.constant 128 : i32
    %2 = arith.muli %1, %c128_i32 : i32
    %3 = tpu.assume_multiple %2, 128 : i32
    %c0 = arith.constant 0 : index
    %4 = arith.index_cast %3 : i32 to index
    %c0_1 = arith.constant 0 : index
    %5 = vector.load %arg2[%c0, %4, %c0_1] : memref<1x128x16xbf16, #tpu.memory_space<vmem>>, vector<1x128x16xbf16>
    %6 = vector.shape_cast %5 : vector<1x128x16xbf16> to vector<128x16xbf16>
    %c0_2 = arith.constant 0 : index
    %c0_3 = arith.constant 0 : index
    %7 = vector.load %arg3[%c0_2, %c0_3] : memref<16x16xbf16, #tpu.memory_space<vmem>>, vector<16x16xbf16>
    %cst = arith.constant dense<0.000000e+00> : vector<128x16xf32>
    %8 = tpu.matmul %6, %7, %cst {dimension_numbers = #tpu.dot_dimension_numbers<[1], [0], [0], [1], [0, 0, 1, 1], [], []>} : vector<128x16xbf16>, vector<16x16xbf16>, vector<128x16xf32> -> vector<128x16xf32>
    %c0_4 = arith.constant 0 : index
    %c0_5 = arith.constant 0 : index
    %9 = vector.load %arg4[%c0_4, %c0_5] : memref<1x16xf32, #tpu.memory_space<vmem>>, vector<1x16xf32>
    %10 = vector.broadcast %9 : vector<1x16xf32> to vector<128x16xf32>
    %11 = arith.addf %8, %10 : vector<128x16xf32>
    %cst_6 = arith.constant 0.000000e+00 : f32
    %12 = vector.broadcast %cst_6 : f32 to vector<128x16xf32>
    %13 = arith.maximumf %11, %12 : vector<128x16xf32>
    %14 = arith.truncf %13 : vector<128x16xf32> to vector<128x16xbf16>
    %c0_7 = arith.constant 0 : index
    %c0_8 = arith.constant 0 : index
    %15 = vector.load %arg5[%c0_7, %c0_8] : memref<16x128xbf16, #tpu.memory_space<vmem>>, vector<16x128xbf16>
    %cst_9 = arith.constant dense<0.000000e+00> : vector<128x128xf32>
    %16 = tpu.matmul %14, %15, %cst_9 {dimension_numbers = #tpu.dot_dimension_numbers<[1], [0], [0], [1], [0, 0, 1, 1], [], []>} : vector<128x16xbf16>, vector<16x128xbf16>, vector<128x128xf32> -> vector<128x128xf32>
    %17 = vector.shape_cast %16 : vector<128x128xf32> to vector<16x8x128xf32>
    %cst_10 = arith.constant dense<0xFF800000> : vector<16x128xf32>
    %18 = vector.multi_reduction <maximumf>, %17, %cst_10 [1] : vector<16x8x128xf32> to vector<16x128xf32>
    %c256_i32 = arith.constant 256 : i32
    %19 = arith.muli %1, %c256_i32 : i32
    %20 = tpu.assume_multiple %19, 256 : i32
    %c0_11 = arith.constant 0 : index
    %21 = arith.index_cast %20 : i32 to index
    %c0_12 = arith.constant 0 : index
    %22 = vector.load %arg6[%c0_11, %21, %c0_12] : memref<1x256x16xbf16, #tpu.memory_space<vmem>>, vector<1x256x16xbf16>
    %23 = vector.shape_cast %22 : vector<1x256x16xbf16> to vector<256x16xbf16>
    %c0_13 = arith.constant 0 : index
    %c0_14 = arith.constant 0 : index
    %24 = vector.load %arg7[%c0_13, %c0_14] : memref<16x16xbf16, #tpu.memory_space<vmem>>, vector<16x16xbf16>
    %cst_15 = arith.constant dense<0.000000e+00> : vector<256x16xf32>
    %25 = tpu.matmul %23, %24, %cst_15 {dimension_numbers = #tpu.dot_dimension_numbers<[1], [0], [0], [1], [0, 0, 1, 1], [], []>} : vector<256x16xbf16>, vector<16x16xbf16>, vector<256x16xf32> -> vector<256x16xf32>
    %c0_16 = arith.constant 0 : index
    %c0_17 = arith.constant 0 : index
    %26 = vector.load %arg8[%c0_16, %c0_17] : memref<1x16xf32, #tpu.memory_space<vmem>>, vector<1x16xf32>
    %27 = vector.broadcast %26 : vector<1x16xf32> to vector<256x16xf32>
    %28 = arith.addf %25, %27 : vector<256x16xf32>
    %cst_18 = arith.constant 0.000000e+00 : f32
    %29 = vector.broadcast %cst_18 : f32 to vector<256x16xf32>
    %30 = arith.maximumf %28, %29 : vector<256x16xf32>
    %31 = arith.truncf %30 : vector<256x16xf32> to vector<256x16xbf16>
    %c0_19 = arith.constant 0 : index
    %c0_20 = arith.constant 0 : index
    %32 = vector.load %arg9[%c0_19, %c0_20] : memref<16x128xbf16, #tpu.memory_space<vmem>>, vector<16x128xbf16>
    %cst_21 = arith.constant dense<0.000000e+00> : vector<256x128xf32>
    %33 = tpu.matmul %31, %32, %cst_21 {dimension_numbers = #tpu.dot_dimension_numbers<[1], [0], [0], [1], [0, 0, 1, 1], [], []>} : vector<256x16xbf16>, vector<16x128xbf16>, vector<256x128xf32> -> vector<256x128xf32>
    %34 = vector.shape_cast %33 : vector<256x128xf32> to vector<16x16x128xf32>
    %cst_22 = arith.constant dense<0xFF800000> : vector<16x128xf32>
    %35 = vector.multi_reduction <maximumf>, %34, %cst_22 [1] : vector<16x16x128xf32> to vector<16x128xf32>
    %36 = arith.addf %18, %35 : vector<16x128xf32>
    %c16_i32 = arith.constant 16 : i32
    %37 = arith.muli %1, %c16_i32 : i32
    %38 = tpu.assume_multiple %37, 16 : i32
    %39 = arith.index_cast %38 : i32 to index
    %c0_23 = arith.constant 0 : index
    %40 = vector.load %arg12[%39, %c0_23] : memref<16x128xf32, #tpu.memory_space<vmem>>, vector<16x128xf32>
    tpu.vector_store %arg12[%39, %c0_23], %36 {strides = array<i32>} : memref<16x128xf32, #tpu.memory_space<vmem>>, vector<16x128xf32>,
    %c1_i32_24 = arith.constant 1 : i32
    %c0_25 = arith.constant 0 : index
    %c0_26 = arith.constant 0 : index
    %41 = vector.load %arg12[%c0_25, %c0_26] : memref<16x128xf32, #tpu.memory_space<vmem>>, vector<16x128xf32>
    %c0_27 = arith.constant 0 : index
    %c0_28 = arith.constant 0 : index
    %42 = vector.load %arg10[%c0_27, %c0_28] : memref<1x128xf32, #tpu.memory_space<vmem>>, vector<1x128xf32>
    %43 = vector.broadcast %42 : vector<1x128xf32> to vector<16x128xf32>
    %44 = arith.addf %41, %43 : vector<16x128xf32>
    %cst_29 = arith.constant 0.000000e+00 : f32
    %45 = vector.broadcast %cst_29 : f32 to vector<16x128xf32>
    %46 = arith.maximumf %44, %45 : vector<16x128xf32>
    %47 = tpu.transpose %46, [1, 0] : vector<16x128xf32> -> vector<128x16xf32>
    %c0_30 = arith.constant 0 : index
    %c0_31 = arith.constant 0 : index
    %c0_32 = arith.constant 0 : index
    %48 = vector.load %arg11[%c0_30, %c0_31, %c0_32] : memref<1x128x16xf32, #tpu.memory_space<vmem>>, vector<1x128x16xf32>
    %49 = vector.shape_cast %48 : vector<1x128x16xf32> to vector<128x16xf32>
    %50 = vector.shape_cast %47 : vector<128x16xf32> to vector<1x128x16xf32>
    tpu.vector_store %arg11[%c0_30, %c0_31, %c0_32], %50 {strides = array<i32>} : memref<1x128x16xf32, #tpu.memory_space<vmem>>, vector<1x128x16xf32>,
    return
  }
  func.func @transform_0(%arg0: i32, %arg1: i32) -> (i32, i32, i32) {
    %c0_i32 = arith.constant 0 : i32
    %c0_i32_0 = arith.constant 0 : i32
    return %arg0, %arg1, %c0_i32 : i32, i32, i32
  }
  func.func @transform_1(%arg0: i32, %arg1: i32) -> (i32, i32) {
    %c0_i32 = arith.constant 0 : i32
    %c0_i32_0 = arith.constant 0 : i32
    %c0_i32_1 = arith.constant 0 : i32
    return %c0_i32, %c0_i32_0 : i32, i32
  }
  func.func @transform_2(%arg0: i32, %arg1: i32) -> (i32, i32) {
    %c0_i32 = arith.constant 0 : i32
    %c0_i32_0 = arith.constant 0 : i32
    %c0_i32_1 = arith.constant 0 : i32
    return %c0_i32, %c0_i32_0 : i32, i32
  }
  func.func @transform_3(%arg0: i32, %arg1: i32) -> (i32, i32) {
    %c0_i32 = arith.constant 0 : i32
    %c0_i32_0 = arith.constant 0 : i32
    %c0_i32_1 = arith.constant 0 : i32
    return %c0_i32, %c0_i32_0 : i32, i32
  }
  func.func @transform_4(%arg0: i32, %arg1: i32) -> (i32, i32, i32) {
    %c0_i32 = arith.constant 0 : i32
    %c0_i32_0 = arith.constant 0 : i32
    return %arg0, %arg1, %c0_i32 : i32, i32, i32
  }
  func.func @transform_5(%arg0: i32, %arg1: i32) -> (i32, i32) {
    %c0_i32 = arith.constant 0 : i32
    %c0_i32_0 = arith.constant 0 : i32
    %c0_i32_1 = arith.constant 0 : i32
    return %c0_i32, %c0_i32_0 : i32, i32
  }
  func.func @transform_6(%arg0: i32, %arg1: i32) -> (i32, i32) {
    %c0_i32 = arith.constant 0 : i32
    %c0_i32_0 = arith.constant 0 : i32
    %c0_i32_1 = arith.constant 0 : i32
    return %c0_i32, %c0_i32_0 : i32, i32
  }
  func.func @transform_7(%arg0: i32, %arg1: i32) -> (i32, i32) {
    %c0_i32 = arith.constant 0 : i32
    %c0_i32_0 = arith.constant 0 : i32
    %c0_i32_1 = arith.constant 0 : i32
    return %c0_i32, %c0_i32_0 : i32, i32
  }
  func.func @transform_8(%arg0: i32, %arg1: i32) -> (i32, i32) {
    %c0_i32 = arith.constant 0 : i32
    %c0_i32_0 = arith.constant 0 : i32
    %c0_i32_1 = arith.constant 0 : i32
    return %c0_i32, %c0_i32_0 : i32, i32
  }
  func.func @transform_9(%arg0: i32, %arg1: i32) -> (i32, i32, i32) {
    %c0_i32 = arith.constant 0 : i32
    %c0_i32_0 = arith.constant 0 : i32
    return %arg0, %c0_i32, %arg1 : i32, i32, i32
  }
}

</mosaic_0001>

<bundles_post_ra>
// kernel: custom-call.12
= control target key start
LH: loop header
LB: loop body
LE: loop exit
PB: predicated region body
PF: predicated region fallthrough
CT: control target
= control target key end

     0   :  { %s6_s0 = inlined_call_operand.vmem [shape: s32[2,16], index: 0, kind: output, shape index: {}]  }

// kernel: custom-call.8
= control target key start
LH: loop header
LB: loop body
LE: loop exit
PB: predicated region body
PF: predicated region fallthrough
CT: control target
= control target key end

     0   :  { %s6_s0 = inlined_call_operand.vmem [shape: f32[2,64], index: 0, kind: output, shape index: {}]  }

// kernel: _lambda_.1
= control target key start
LH: loop header
LB: loop body
LE: loop exit
PB: predicated region body
PF: predicated region fallthrough
CT: control target
= control target key end

     0   :  { %s2158_s30 = smov 0   ;;  %s2160_s10 = smov 0   ;;  %s2425_s0 = inlined_call_operand.vmem [shape: bf16[2,128,16], index: 0, kind: input, shape index: {}]   ;;  %s2426_s1 = inlined_call_operand.vmem [shape: bf16[16,16], index: 1, kind: input, shape index: {}]   ;;  %s2427_s2 = inlined_call_operand.vmem [shape: f32[1,16], index: 2, kind: input, shape index: {}, may-alias: {2,6}]   ;;  %s2428_s3 = inlined_call_operand.vmem [shape: bf16[16,128], index: 3, kind: input, shape index: {}]   ;;  %s2429_s4 = inlined_call_operand.vmem [shape: bf16[2,256,16], index: 4, kind: input, shape index: {}]   ;;  %s2430_s5 = inlined_call_operand.vmem [shape: bf16[16,16], index: 5, kind: input, shape index: {}]   ;;  %s2431_s6 = inlined_call_operand.vmem [shape: f32[1,16], index: 6, kind: input, shape index: {}, may-alias: {2,6}]   ;;  %s2432_s7 = inlined_call_operand.vmem [shape: bf16[16,128], index: 7, kind: input, shape index: {}]   ;;  %s2433_s8 = inlined_call_operand.vmem [shape: f32[1,128], index: 8, kind: input, shape index: {}]   ;;  %s2434_s9 = inlined_call_operand.vmem [shape: f32[2,128,16], index: 9, kind: output, shape index: {}]  }
   0x1   :  { %s2162_s11 = smov 0  }
   0x2 LB: > { %s31_s12 = sadd.s32 1, %s2102_s10  ;;  %p1784_p0 = scmp.ge.s32.totalorder %s2106_s11, 1  ;;  %s2106_s11 = sphi %s2162_s11, %s19_s11   ;;  %s2102_s10 = sphi %s2160_s10, %s2436_s10   ;;  %s2098_s30 = sphi %s2158_s30, %s2435_s30  }
   0x3   : > { %p33_p1 = scmp.ge.s32.totalorder %s31_s12, 2  ;;  %p325_p2 = scmp.lt.s32.totalorder %s2106_s11, 3 }
   0x5   : > { %s2438_s12 = smov (%p33_p1, %s31_s12), 0  ;;  %p326_p3 = pnand %p1784_p0, %p325_p2 }
   0x6   : > { %p378_p4 = scmp.lt.s32.totalorder (!%p326_p3), %s2098_s30, 1 }
   0x7   : > { %329 = sbr.rel (%p326_p3) target bundleno = 714 (0x2ca), region = 56 }
   0xc   : > { %v2056_v0 = vld [vmem:[%s2426_s1] sm:$0xff]   ;;  %s2440_s30 = smov (!%p378_p4, %s2098_s30), 1  ;;  %vm477_vm0 = vcmask 130048   ;;  %vm1593_vm1 = vcmask 1041409   ;;  %vm1595_vm2 = vcmask 1042434   ;;  %vm1597_vm3 = vcmask 1043459  }
   0xd   : > { %v2058_v1 = vld [vmem:[%s2430_s5] sm:$0xff]   ;;  %1927 = vmatprep.subr.bf16.mxu0 %v2056_v0  ;;  %s1872_s17 = sshll.u32 %s2440_s30, 6  ;;  %s1873_s21 = sshll.u32 %s2440_s30, 7  ;;  %vm1599_vm4 = vcmask 1044484   ;;  %vm1601_vm5 = vcmask 1045509   ;;  %vm1603_vm6 = vcmask 1046534  }
   0xe   : > { %1928 = vmatpush3.bf16.msra.mxu0 %v2056_v0  ;;  %s385_s20 = scalar_lea.vmem %s2425_s0, %s1872_s17  ;;  %s2197_s24 = scalar_lea.vmem %s2429_s4, %s1873_s21  ;;  %v2082_v23 = vld [vmem:[%s2428_s3] sm:$0xff]   ;;  %vm1605_vm7 = vcmask 1047559  }
   0xf   : > { %1963 = vmatprep.subr.bf16.mxu0 %v2058_v1  ;;  %v2057_v2 = vld [vmem:[%s385_s20] sm:$0xff]   ;;  %v2059_v3 = vld [vmem:[%s385_s20 + $0x8] sm:$0xff]   ;;  %v2060_v4 = vld [vmem:[%s385_s20 + $0x10] sm:$0xff]   ;;  %1945 = vmatprep.subr.bf16.mxu1 %v2082_v23 }
  0x10   : > { %1929 = vmatprep.mubr.msk.bf16.mxu0 %vm477_vm0, %v2057_v2  ;;  %v2061_v5 = vld [vmem:[%s385_s20 + $0x18] sm:$0xff]   ;;  %v2062_v6 = vld [vmem:[%s385_s20 + $0x20] sm:$0xff]   ;;  %v2063_v7 = vld [vmem:[%s385_s20 + $0x28] sm:$0xff]   ;;  %1946 = vmatpush3.bf16.msra.mxu1 %v2082_v23 }
  0x11   : > { %1930 = vmatmul.mubr.msk.bf16.vlgmr.msra.gmra.mxu0 %vm477_vm0, %v2059_v3  ;;  %v2064_v8 = vld [vmem:[%s385_s20 + $0x30] sm:$0xff]   ;;  %v2065_v9 = vld [vmem:[%s385_s20 + $0x38] sm:$0xff]   ;;  %v2066_v10 = vld [vmem:[%s2197_s24] sm:$0xff]   ;;  %s2382_s20 = scalar_lea.vmem %s2434_s9, %s1873_s21 }
  0x12   : > { %1964 = vmatpush3.bf16.msra.mxu0 %v2058_v1  ;;  %1933 = vmatprep.mubr.msk.bf16.mxu0 %vm477_vm0, %v2060_v4  ;;  %v2067_v11 = vld [vmem:[%s2197_s24 + $0x8] sm:$0xff]   ;;  %v2068_v12 = vld [vmem:[%s2197_s24 + $0x10] sm:$0xff]   ;;  %v2069_v13 = vld [vmem:[%s2197_s24 + $0x18] sm:$0xff]  }
  0x13   : > { %v2070_v14 = vld [vmem:[%s2197_s24 + $0x20] sm:$0xff]   ;;  %v2071_v15 = vld [vmem:[%s2197_s24 + $0x28] sm:$0xff]   ;;  %v2072_v16 = vld [vmem:[%s2197_s24 + $0x30] sm:$0xff]  }
  0x14   : > { %v2073_v17 = vld [vmem:[%s2197_s24 + $0x38] sm:$0xff]   ;;  %v2074_v18 = vld [vmem:[%s2197_s24 + $0x40] sm:$0xff]   ;;  %v2075_v19 = vld [vmem:[%s2197_s24 + $0x48] sm:$0xff]  }
  0x15   : > { %v2076_v20 = vld [vmem:[%s2197_s24 + $0x50] sm:$0xff]   ;;  %v2077_v21 = vld [vmem:[%s2197_s24 + $0x58] sm:$0xff]   ;;  %v2078_v22 = vld [vmem:[%s2197_s24 + $0x60] sm:$0xff]  }
  0x16   : > { %v2079_v24 = vld [vmem:[%s2197_s24 + $0x68] sm:$0xff]   ;;  %v2080_v25 = vld [vmem:[%s2197_s24 + $0x70] sm:$0xff]   ;;  %v2083_v26 = vld [vmem:[%s2432_s7] sm:$0xff]  }
  0x17   : > { %1997 = vmatprep.subr.bf16.mxu1 %v2083_v26  ;;  %v2081_v27 = vld [vmem:[%s2197_s24 + $0x78] sm:$0xff]   ;;  %v1791_v30 = vld [vmem:[%s2427_s2] ss:$0 sm:$0xff] }
  0x19   : > { %1934 = vmatmul.mubr.msk.bf16.gmra.mxu0 %vm477_vm0, %v2061_v5 }
  0x1a   : > { %1937 = vmatprep.mubr.msk.bf16.mxu0 %vm477_vm0, %v2062_v6 }
  0x21   : > { %1938 = vmatmul.mubr.msk.bf16.gmra.mxu0 %vm477_vm0, %v2063_v7 }
  0x22   : > { %1941 = vmatprep.mubr.msk.bf16.mxu0 %vm477_vm0, %v2064_v8 }
  0x29   : > { %1942 = vmatmul.mubr.msk.bf16.gmra.mxu0 %vm477_vm0, %v2065_v9 }
  0x2a   : > { %1965 = vmatprep.mubr.msk.bf16.mxu0 %vm477_vm0, %v2066_v10 }
  0x31   : > { %1966 = vmatmul.mubr.msk.bf16.vlgmr.msra.gmra.mxu0 %vm477_vm0, %v2067_v11 }
  0x32   : > { %1969 = vmatprep.mubr.msk.bf16.mxu0 %vm477_vm0, %v2068_v12 }
  0x39   : > { %1970 = vmatmul.mubr.msk.bf16.gmra.mxu0 %vm477_vm0, %v2069_v13 }
  0x3a   : > { %1973 = vmatprep.mubr.msk.bf16.mxu0 %vm477_vm0, %v2070_v14 }
  0x41   : > { %1974 = vmatmul.mubr.msk.bf16.gmra.mxu0 %vm477_vm0, %v2071_v15 }
  0x42   : > { %1977 = vmatprep.mubr.msk.bf16.mxu0 %vm477_vm0, %v2072_v16 }
  0x49   : > { %1978 = vmatmul.mubr.msk.bf16.gmra.mxu0 %vm477_vm0, %v2073_v17 }
  0x4a   : > { %1981 = vmatprep.mubr.msk.bf16.mxu0 %vm477_vm0, %v2074_v18 }
  0x51   : > { %1982 = vmatmul.mubr.msk.bf16.gmra.mxu0 %vm477_vm0, %v2075_v19 }
  0x52   : > { %1985 = vmatprep.mubr.msk.bf16.mxu0 %vm477_vm0, %v2076_v20 }
  0x59   : > { %1986 = vmatmul.mubr.msk.bf16.gmra.mxu0 %vm477_vm0, %v2077_v21 }
  0x5a   : > { %1989 = vmatprep.mubr.msk.bf16.mxu0 %vm477_vm0, %v2078_v22  ;;  %v2254_v22 = vld [vmem:[%s2431_s6] ss:$0 sm:$0xff] }
  0x61   : > { %1990 = vmatmul.mubr.msk.bf16.gmra.mxu0 %vm477_vm0, %v2079_v24 }
  0x62   : > { %1993 = vmatprep.mubr.msk.bf16.mxu0 %vm477_vm0, %v2080_v25 }
  0x69   : > { %1994 = vmatmul.mubr.msk.bf16.gmra.mxu0 %vm477_vm0, %v2081_v27 }
  0xd1   : > { %v1931_v28 = vpop.f32.mrf.mxu0 }
  0xd2   : > { %v545_v34 = vadd.f32 %v1931_v28, %v1791_v30 }
  0xd3   : > { %v536_v29 = vpop.f32.mrf.mxu0 }
  0xd4   : > { %v537_v32 = vadd.f32 %v1791_v30, %v536_v29  ;;  %v601_v41 = vmax.f32 %v545_v34, 0.0 }
  0xd5   : > { %v1932_v31 = vpop.f32.mrf.mxu0 }
  0xd6   : > { %v548_v33 = vadd.f32 %v1932_v31, %v1791_v30  ;;  %v599_v39 = vmax.f32 %v537_v32, 0.0 }
  0xd7   : > { %v539_v35 = vpop.f32.mrf.mxu0 }
  0xd8   : > { %v540_v36 = vadd.f32 %v1791_v30, %v539_v35  ;;  %v602_v37 = vmax.f32 %v548_v33, 0.0 }
  0xd9   : > { %v1935_v38 = vpop.f32.mrf.mxu0 }
  0xda   : > { %v600_v40 = vmax.f32 %v540_v36, 0.0  ;;  %v616_v44 = vpack.c.bf16 %v602_v37, %v601_v41  ;;  %v561_v48 = vadd.f32 %v1935_v38, %v1791_v30 }
  0xdb   : > { %v552_v42 = vpop.f32.mrf.mxu0 }
  0xdc   : > { %v615_v43 = vpack.c.bf16 %v600_v40, %v599_v39  ;;  %v553_v46 = vadd.f32 %v1791_v30, %v552_v42  ;;  %v605_v55 = vmax.f32 %v561_v48, 0.0 }
  0xdd   : > { %v1936_v45 = vpop.f32.mrf.mxu0 }
  0xde   : > { %v564_v47 = vadd.f32 %v1936_v45, %v1791_v30  ;;  %1947 = vmatprep.mubr.msk.bf16.mxu1 %vm477_vm0, %v615_v43  ;;  %v603_v53 = vmax.f32 %v553_v46, 0.0 }
  0xdf   : > { %v555_v49 = vpop.f32.mrf.mxu0  ;;  %1948 = vmatmul.mubr.msk.bf16.vlgmr.msra.gmra.mxu1 %vm477_vm0, %v616_v44 }
  0xe0   : > { %v556_v50 = vadd.f32 %v1791_v30, %v555_v49  ;;  %1998 = vmatpush3.bf16.msra.mxu1 %v2083_v26  ;;  %v606_v51 = vmax.f32 %v564_v47, 0.0 }
  0xe1   : > { %v1939_v52 = vpop.f32.mrf.mxu0 }
  0xe2   : > { %v604_v54 = vmax.f32 %v556_v50, 0.0  ;;  %v618_v58 = vpack.c.bf16 %v606_v51, %v605_v55  ;;  %v577_v62 = vadd.f32 %v1939_v52, %v1791_v30 }
  0xe3   : > { %v568_v56 = vpop.f32.mrf.mxu0 }
  0xe4   : > { %v617_v57 = vpack.c.bf16 %v604_v54, %v603_v53  ;;  %v569_v60 = vadd.f32 %v1791_v30, %v568_v56  ;;  %v609_v5 = vmax.f32 %v577_v62, 0.0 }
  0xe5   : > { %v1940_v59 = vpop.f32.mrf.mxu0 }
  0xe6   : > { %v580_v61 = vadd.f32 %v1940_v59, %v1791_v30  ;;  %1951 = vmatprep.mubr.msk.bf16.mxu1 %vm477_vm0, %v617_v57  ;;  %v607_v3 = vmax.f32 %v569_v60, 0.0 }
  0xe7   : > { %v571_v63 = vpop.f32.mrf.mxu0  ;;  %1952 = vmatmul.mubr.msk.bf16.gmra.mxu1 %vm477_vm0, %v618_v58 }
  0xe8   : > { %v572_v0 = vadd.f32 %v1791_v30, %v571_v63  ;;  %v610_v1 = vmax.f32 %v580_v61, 0.0 }
  0xe9   : > { %v1943_v2 = vpop.f32.mrf.mxu0 }
  0xea   : > { %v608_v4 = vmax.f32 %v572_v0, 0.0  ;;  %v620_v8 = vpack.c.bf16 %v610_v1, %v609_v5  ;;  %v593_v12 = vadd.f32 %v1943_v2, %v1791_v30 }
  0xeb   : > { %v584_v6 = vpop.f32.mrf.mxu0 }
  0xec   : > { %v619_v7 = vpack.c.bf16 %v608_v4, %v607_v3  ;;  %v585_v10 = vadd.f32 %v1791_v30, %v584_v6  ;;  %v613_v19 = vmax.f32 %v593_v12, 0.0 }
  0xed   : > { %v1944_v9 = vpop.f32.mrf.mxu0 }
  0xee   : > { %v596_v11 = vadd.f32 %v1944_v9, %v1791_v30  ;;  %1955 = vmatprep.mubr.msk.bf16.mxu1 %vm477_vm0, %v619_v7  ;;  %v611_v17 = vmax.f32 %v585_v10, 0.0 }
  0xef   : > { %v587_v13 = vpop.f32.mrf.mxu0  ;;  %1956 = vmatmul.mubr.msk.bf16.gmra.mxu1 %vm477_vm0, %v620_v8 }
  0xf0   : > { %v588_v14 = vadd.f32 %v1791_v30, %v587_v13  ;;  %v614_v15 = vmax.f32 %v596_v11, 0.0 }
  0xf1   : > { %v1967_v16 = vpop.f32.mrf.mxu0 }
  0xf2   : > { %v612_v18 = vmax.f32 %v588_v14, 0.0  ;;  %v622_v23 = vpack.c.bf16 %v614_v15, %v613_v19  ;;  %v1066_v27 = vadd.f32 %v1967_v16, %v2254_v22 }
  0xf3   : > { %v1057_v20 = vpop.f32.mrf.mxu0 }
  0xf4   : > { %v621_v21 = vpack.c.bf16 %v612_v18, %v611_v17  ;;  %v1058_v25 = vadd.f32 %v2254_v22, %v1057_v20  ;;  %v1186_v34 = vmax.f32 %v1066_v27, 0.0 }
  0xf5   : > { %v1968_v24 = vpop.f32.mrf.mxu0 }
  0xf6   : > { %v1069_v26 = vadd.f32 %v1968_v24, %v2254_v22  ;;  %1959 = vmatprep.mubr.msk.bf16.mxu1 %vm477_vm0, %v621_v21  ;;  %v1184_v32 = vmax.f32 %v1058_v25, 0.0 }
  0xf7   : > { %1960 = vmatmul.mubr.msk.bf16.gmra.mxu1 %vm477_vm0, %v622_v23  ;;  %v1060_v28 = vpop.f32.mrf.mxu0 }
  0xf8   : > { %v1061_v29 = vadd.f32 %v2254_v22, %v1060_v28  ;;  %v1187_v30 = vmax.f32 %v1069_v26, 0.0 }
  0xf9   : > { %v1971_v31 = vpop.f32.mrf.mxu0 }
  0xfa   : > { %v1185_v33 = vmax.f32 %v1061_v29, 0.0  ;;  %v1217_v37 = vpack.c.bf16 %v1187_v30, %v1186_v34  ;;  %v1082_v41 = vadd.f32 %v1971_v31, %v2254_v22 }
  0xfb   : > { %v1073_v35 = vpop.f32.mrf.mxu0 }
  0xfc   : > { %v1216_v36 = vpack.c.bf16 %v1185_v33, %v1184_v32  ;;  %v1074_v39 = vadd.f32 %v2254_v22, %v1073_v35  ;;  %v1190_v48 = vmax.f32 %v1082_v41, 0.0 }
  0xfd   : > { %v1972_v38 = vpop.f32.mrf.mxu0 }
  0xfe   : > { %v1085_v40 = vadd.f32 %v1972_v38, %v2254_v22  ;;  %1999 = vmatprep.mubr.msk.bf16.mxu1 %vm477_vm0, %v1216_v36  ;;  %v1188_v46 = vmax.f32 %v1074_v39, 0.0 }
  0xff   : > { %v1076_v42 = vpop.f32.mrf.mxu0  ;;  %2000 = vmatmul.mubr.msk.bf16.vlgmr.msra.gmra.mxu1 %vm477_vm0, %v1217_v37 }
 0x100   : > { %v1077_v43 = vadd.f32 %v2254_v22, %v1076_v42  ;;  %v1191_v44 = vmax.f32 %v1085_v40, 0.0 }
 0x101   : > { %v1975_v45 = vpop.f32.mrf.mxu0 }
 0x102   : > { %v1189_v47 = vmax.f32 %v1077_v43, 0.0  ;;  %v1219_v51 = vpack.c.bf16 %v1191_v44, %v1190_v48  ;;  %v1098_v55 = vadd.f32 %v1975_v45, %v2254_v22 }
 0x103   : > { %v1089_v49 = vpop.f32.mrf.mxu0 }
 0x104   : > { %v1218_v50 = vpack.c.bf16 %v1189_v47, %v1188_v46  ;;  %v1090_v53 = vadd.f32 %v2254_v22, %v1089_v49  ;;  %v1194_v62 = vmax.f32 %v1098_v55, 0.0 }
 0x105   : > { %v1976_v52 = vpop.f32.mrf.mxu0 }
 0x106   : > { %v1101_v54 = vadd.f32 %v1976_v52, %v2254_v22  ;;  %2003 = vmatprep.mubr.msk.bf16.mxu1 %vm477_vm0, %v1218_v50  ;;  %v1192_v60 = vmax.f32 %v1090_v53, 0.0 }
 0x107   : > { %v1092_v56 = vpop.f32.mrf.mxu0  ;;  %2004 = vmatmul.mubr.msk.bf16.gmra.mxu1 %vm477_vm0, %v1219_v51 }
 0x108   : > { %v1093_v57 = vadd.f32 %v2254_v22, %v1092_v56  ;;  %v1195_v58 = vmax.f32 %v1101_v54, 0.0 }
 0x109   : > { %v1979_v59 = vpop.f32.mrf.mxu0 }
 0x10a   : > { %v1193_v61 = vmax.f32 %v1093_v57, 0.0  ;;  %v1221_v1 = vpack.c.bf16 %v1195_v58, %v1194_v62  ;;  %v1114_v5 = vadd.f32 %v1979_v59, %v2254_v22 }
 0x10b   : > { %v1105_v63 = vpop.f32.mrf.mxu0 }
 0x10c   : > { %v1220_v0 = vpack.c.bf16 %v1193_v61, %v1192_v60  ;;  %v1106_v3 = vadd.f32 %v2254_v22, %v1105_v63  ;;  %v1198_v12 = vmax.f32 %v1114_v5, 0.0 }
 0x10d   : > { %v1980_v2 = vpop.f32.mrf.mxu0 }
 0x10e   : > { %v1117_v4 = vadd.f32 %v1980_v2, %v2254_v22  ;;  %2007 = vmatprep.mubr.msk.bf16.mxu1 %vm477_vm0, %v1220_v0  ;;  %v1196_v10 = vmax.f32 %v1106_v3, 0.0 }
 0x10f   : > { %v1108_v6 = vpop.f32.mrf.mxu0  ;;  %2008 = vmatmul.mubr.msk.bf16.gmra.mxu1 %vm477_vm0, %v1221_v1 }
 0x110   : > { %v1109_v7 = vadd.f32 %v2254_v22, %v1108_v6  ;;  %v1199_v8 = vmax.f32 %v1117_v4, 0.0 }
 0x111   : > { %v1983_v9 = vpop.f32.mrf.mxu0 }
 0x112   : > { %v1197_v11 = vmax.f32 %v1109_v7, 0.0  ;;  %v1223_v15 = vpack.c.bf16 %v1199_v8, %v1198_v12  ;;  %v1130_v19 = vadd.f32 %v1983_v9, %v2254_v22 }
 0x113   : > { %v1121_v13 = vpop.f32.mrf.mxu0 }
 0x114   : > { %v1222_v14 = vpack.c.bf16 %v1197_v11, %v1196_v10  ;;  %v1122_v17 = vadd.f32 %v2254_v22, %v1121_v13  ;;  %v1202_v27 = vmax.f32 %v1130_v19, 0.0 }
 0x115   : > { %v1984_v16 = vpop.f32.mrf.mxu0 }
 0x116   : > { %v1133_v18 = vadd.f32 %v1984_v16, %v2254_v22  ;;  %2011 = vmatprep.mubr.msk.bf16.mxu1 %vm477_vm0, %v1222_v14  ;;  %v1200_v25 = vmax.f32 %v1122_v17, 0.0 }
 0x117   : > { %v1124_v20 = vpop.f32.mrf.mxu0  ;;  %2012 = vmatmul.mubr.msk.bf16.gmra.mxu1 %vm477_vm0, %v1223_v15 }
 0x118   : > { %v1125_v21 = vadd.f32 %v2254_v22, %v1124_v20  ;;  %v1203_v23 = vmax.f32 %v1133_v18, 0.0 }
 0x119   : > { %v1987_v24 = vpop.f32.mrf.mxu0 }
 0x11a   : > { %v1201_v26 = vmax.f32 %v1125_v21, 0.0  ;;  %v1225_v30 = vpack.c.bf16 %v1203_v23, %v1202_v27  ;;  %v1146_v34 = vadd.f32 %v1987_v24, %v2254_v22 }
 0x11b   : > { %v1137_v28 = vpop.f32.mrf.mxu0 }
 0x11c   : > { %v1224_v29 = vpack.c.bf16 %v1201_v26, %v1200_v25  ;;  %v1138_v32 = vadd.f32 %v2254_v22, %v1137_v28  ;;  %v1206_v41 = vmax.f32 %v1146_v34, 0.0 }
 0x11d   : > { %v1988_v31 = vpop.f32.mrf.mxu0 }
 0x11e   : > { %v1149_v33 = vadd.f32 %v1988_v31, %v2254_v22  ;;  %2015 = vmatprep.mubr.msk.bf16.mxu1 %vm477_vm0, %v1224_v29  ;;  %v1204_v39 = vmax.f32 %v1138_v32, 0.0 }
 0x11f   : > { %v1140_v35 = vpop.f32.mrf.mxu0  ;;  %2016 = vmatmul.mubr.msk.bf16.gmra.mxu1 %vm477_vm0, %v1225_v30 }
 0x120   : > { %v1141_v36 = vadd.f32 %v2254_v22, %v1140_v35  ;;  %v1207_v37 = vmax.f32 %v1149_v33, 0.0 }
 0x121   : > { %v1991_v38 = vpop.f32.mrf.mxu0 }
 0x122   : > { %v1205_v40 = vmax.f32 %v1141_v36, 0.0  ;;  %v1227_v44 = vpack.c.bf16 %v1207_v37, %v1206_v41  ;;  %v1162_v48 = vadd.f32 %v1991_v38, %v2254_v22 }
 0x123   : > { %v1153_v42 = vpop.f32.mrf.mxu0 }
 0x124   : > { %v1226_v43 = vpack.c.bf16 %v1205_v40, %v1204_v39  ;;  %v1154_v46 = vadd.f32 %v2254_v22, %v1153_v42  ;;  %v1210_v55 = vmax.f32 %v1162_v48, 0.0 }
 0x125   : > { %v1992_v45 = vpop.f32.mrf.mxu0 }
 0x126   : > { %v1165_v47 = vadd.f32 %v1992_v45, %v2254_v22  ;;  %2019 = vmatprep.mubr.msk.bf16.mxu1 %vm477_vm0, %v1226_v43  ;;  %v1208_v53 = vmax.f32 %v1154_v46, 0.0 }
 0x127   : > { %v1156_v49 = vpop.f32.mrf.mxu0  ;;  %2020 = vmatmul.mubr.msk.bf16.gmra.mxu1 %vm477_vm0, %v1227_v44 }
 0x128   : > { %v1157_v50 = vadd.f32 %v2254_v22, %v1156_v49  ;;  %v1211_v51 = vmax.f32 %v1165_v47, 0.0 }
 0x129   : > { %v1995_v52 = vpop.f32.mrf.mxu0 }
 0x12a   : > { %v1209_v54 = vmax.f32 %v1157_v50, 0.0  ;;  %v1229_v58 = vpack.c.bf16 %v1211_v51, %v1210_v55  ;;  %v1178_v62 = vadd.f32 %v1995_v52, %v2254_v22 }
 0x12b   : > { %v1169_v56 = vpop.f32.mrf.mxu0 }
 0x12c   : > { %v1228_v57 = vpack.c.bf16 %v1209_v54, %v1208_v53  ;;  %v1170_v60 = vadd.f32 %v2254_v22, %v1169_v56  ;;  %v1214_v4 = vmax.f32 %v1178_v62, 0.0 }
 0x12d   : > { %v1996_v59 = vpop.f32.mrf.mxu0 }
 0x12e   : > { %v1181_v61 = vadd.f32 %v1996_v59, %v2254_v22  ;;  %2023 = vmatprep.mubr.msk.bf16.mxu1 %vm477_vm0, %v1228_v57  ;;  %v1212_v2 = vmax.f32 %v1170_v60, 0.0 }
 0x12f   : > { %v1172_v63 = vpop.f32.mrf.mxu0  ;;  %2024 = vmatmul.mubr.msk.bf16.gmra.mxu1 %vm477_vm0, %v1229_v58 }
 0x130   : > { %v1173_v0 = vadd.f32 %v2254_v22, %v1172_v63  ;;  %v1215_v1 = vmax.f32 %v1181_v61, 0.0 }
 0x132   : > { %v1213_v3 = vmax.f32 %v1173_v0, 0.0  ;;  %v1231_v6 = vpack.c.bf16 %v1215_v1, %v1214_v4 }
 0x134   : > { %v1230_v5 = vpack.c.bf16 %v1213_v3, %v1212_v2 }
 0x136   : > { %2027 = vmatprep.mubr.msk.bf16.mxu1 %vm477_vm0, %v1230_v5 }
 0x137   : > { %2028 = vmatmul.mubr.msk.bf16.gmra.mxu1 %vm477_vm0, %v1231_v6 }
 0x19f   : > { %v1949_v7 = vpop.f32.mrf.mxu1 }
 0x1a0   : > { %v764_v25 = vrot.slane %v1949_v7, 4 }
 0x1a1   : > { %v689_v8 = vpop.f32.mrf.mxu1 }
 0x1a2   : > { %v752_v27 = vrot.slane %v689_v8, 4  ;;  %v765_v33 = vmax.f32 %v1949_v7, %v764_v25 }
 0x1a3   : > { %v1950_v9 = vpop.f32.mrf.mxu1 }
 0x1a4   : > { %v770_v28 = vrot.slane %v1950_v9, 4  ;;  %v753_v36 = vmax.f32 %v689_v8, %v752_v27  ;;  %v766_v42 = vrot.slane %v765_v33, 2 }
 0x1a5   : > { %v692_v10 = vpop.f32.mrf.mxu1 }
 0x1a6   : > { %v758_v29 = vrot.slane %v692_v10, 4  ;;  %v771_v37 = vmax.f32 %v1950_v9, %v770_v28  ;;  %v754_v46 = vrot.slane %v753_v36, 2  ;;  %v767_v54 = vmax.f32 %v765_v33, %v766_v42 }
 0x1a7   : > { %v1953_v11 = vpop.f32.mrf.mxu1 }
 0x1a8   : > { %v759_v38 = vmax.f32 %v692_v10, %v758_v29  ;;  %v788_v39 = vrot.slane %v1953_v11, 4  ;;  %v772_v47 = vrot.slane %v771_v37, 2  ;;  %v755_v60 = vmax.f32 %v753_v36, %v754_v46 }
 0x1a9   : > { %v705_v12 = vpop.f32.mrf.mxu1  ;;  %v768_v4 = vrot.slane %v767_v54, 1 }
 0x1aa   : > { %v760_v48 = vrot.slane %v759_v38, 2  ;;  %v789_v49 = vmax.f32 %v1953_v11, %v788_v39  ;;  %v776_v51 = vrot.slane %v705_v12, 4  ;;  %v773_v61 = vmax.f32 %v771_v37, %v772_v47 }
 0x1ab   : > { %v1954_v13 = vpop.f32.mrf.mxu1 }
 0x1ac   : > { %v794_v55 = vrot.slane %v1954_v13, 4  ;;  %v761_v62 = vmax.f32 %v759_v38, %v760_v48  ;;  %v790_v63 = vrot.slane %v789_v49, 2  ;;  %v777_v1 = vmax.f32 %v705_v12, %v776_v51 }
 0x1ad   : > { %v2306_v14 = vpop.f32.mrf.mxu1 }
 0x1ae   : > { %v795_v5 = vmax.f32 %v1954_v13, %v794_v55  ;;  %v782_v8 = vrot.slane %v2306_v14, 4  ;;  %v762_v25 = vrot.slane %v761_v62, 1  ;;  %v778_v28 = vrot.slane %v777_v1, 2 }
 0x1af   : > { %v2308_v22 = vpop.f32.mrf.mxu1 }
 0x1b0   : > { %v812_v36 = vrot.slane %v2308_v22, 4  ;;  %v779_v46 = vmax.f32 %v777_v1, %v778_v28 }
 0x1b1   : > { %v2310_v15 = vpop.f32.mrf.mxu1 }
 0x1b3   : > { %v2312_v16 = vpop.f32.mrf.mxu1 }
 0x1b5   : > { %v2314_v17 = vpop.f32.mrf.mxu1 }
 0x1b7   : > { %v2316_v18 = vpop.f32.mrf.mxu1 }
 0x1b9   : > { %v2318_v19 = vpop.f32.mrf.mxu1 }
 0x1bb   : > { %v2320_v20 = vpop.f32.mrf.mxu1 }
 0x1bd   : > { %v2322_v21 = vpop.f32.mrf.mxu1 }
 0x1bf   : > { %v2001_v23 = vpop.f32.mrf.mxu1 }
 0x1c1   : > { %v1322_v24 = vpop.f32.mrf.mxu1 }
 0x1c3   : > { %v2002_v26 = vpop.f32.mrf.mxu1 }
 0x1c4   : > { %v1456_v31 = vmax.f32 %v2001_v23, %v2002_v26  ;;  %v756_v23 = vrot.slane %v755_v60, 1  ;;  %v791_v26 = vmax.f32 %v789_v49, %v790_v63 }
 0x1c5   : > { %v1325_v30 = vpop.f32.mrf.mxu1 }
 0x1c6   : > { %v1449_v32 = vmax.f32 %v1322_v24, %v1325_v30  ;;  %v1457_v41 = vrot.slane %v1456_v31, 4  ;;  %v774_v24 = vrot.slane %v773_v61, 1  ;;  %v757_v39 = vmax.f32 %v755_v60, %v756_v23 }
 0x1c7   : > { %v2005_v34 = vpop.f32.mrf.mxu1 }
 0x1c8   : > { %v1450_v35 = vrot.slane %v1449_v32, 4  ;;  %v1458_v52 = vmax.f32 %v1456_v31, %v1457_v41  ;;  %v769_v31 = vmax.f32 %v767_v54, %v768_v4 }
 0x1c9   : > { %v1338_v40 = vpop.f32.mrf.mxu1 }
 0x1ca   : > { %v1451_v44 = vmax.f32 %v1449_v32, %v1450_v35  ;;  %v1459_v2 = vrot.slane %v1458_v52, 2  ;;  %v796_v32 = vrot.slane %v795_v5, 2  ;;  %v783_v35 = vmax.f32 %v2306_v14, %v782_v8 }
 0x1cb   : > { %v2006_v43 = vpop.f32.mrf.mxu1 }
 0x1cc   : > { %v1470_v45 = vmax.f32 %v2005_v34, %v2006_v43  ;;  %v1452_v58 = vrot.slane %v1451_v44, 2  ;;  %v1460_v29 = vmax.f32 %v1458_v52, %v1459_v2  ;;  %v2329_v48 = vmax.f32 %v795_v5, %v796_v32 }
 0x1cd   : > { %v1341_v50 = vpop.f32.mrf.mxu1  ;;  %v784_v52 = vrot.slane %v783_v35, 2 }
 0x1ce   : > { %v1463_v53 = vmax.f32 %v1338_v40, %v1341_v50  ;;  %v1471_v56 = vrot.slane %v1470_v45, 4  ;;  %v1453_v9 = vmax.f32 %v1451_v44, %v1452_v58  ;;  %v2327_v40 = vmax.f32 %v773_v61, %v774_v24 }
 0x1cf   : > { %v2009_v57 = vpop.f32.mrf.mxu1  ;;  %v763_v44 = vmax.f32 %v761_v62, %v762_v25  ;;  %v1461_v47 = vrot.slane %v1460_v29, 1  ;;  %v780_v61 = vrot.slane %v779_v46, 1  ;;  %v785_v5 = vmax.f32 %v783_v35, %v784_v52 }
 0x1d0   : > { %v1464_v59 = vrot.slane %v1463_v53, 4  ;;  %v1472_v6 = vmax.f32 %v1470_v45, %v1471_v56  ;;  %v1454_v37 = vrot.slane %v1453_v9, 1  ;;  %v792_v45 = vrot.slane %v791_v26, 1 }
 0x1d1   : > { %v1354_v0 = vpop.f32.mrf.mxu1  ;;  %v800_v56 = vrot.slane %v2310_v15, 4  ;;  %v1462_v62 = vmax.f32 %v1460_v29, %v1461_v47  ;;  %v781_v25 = vmax.f32 %v779_v46, %v780_v61  ;;  %v818_v29 = vrot.slane %v2312_v16, 4 }
 0x1d2   : > { %v1465_v3 = vmax.f32 %v1463_v53, %v1464_v59  ;;  %v1473_v33 = vrot.slane %v1472_v6, 2  ;;  %v2332_v53 = vmax.f32 %v2308_v22, %v812_v36  ;;  %v1455_v54 = vmax.f32 %v1453_v9, %v1454_v37 }
 0x1d3   : > { %v2010_v7 = vpop.f32.mrf.mxu1  ;;  %v2336_v1 = vmax.f32 %v791_v26, %v792_v45  ;;  %v801_v9 = vmax.f32 %v2310_v15, %v800_v56 }
 0x1d4   : > { %v1466_v10 = vrot.slane %v1465_v3, 2  ;;  %v1484_v11 = vmax.f32 %v2009_v57, %v2010_v7  ;;  %v1474_v49 = vmax.f32 %v1472_v6, %v1473_v33  ;;  %v806_v57 = vrot.slane %v2314_v17, 4 }
 0x1d5   : > { %v1357_v27 = vpop.f32.mrf.mxu1  ;;  %v1561_v6 = vadd.f32 %v1455_v54, %v757_v39 }
 0x1d6   : > { %v1467_v30 = vmax.f32 %v1465_v3, %v1466_v10  ;;  %v1485_v12 = vrot.slane %v1484_v11, 4  ;;  %v1477_v13 = vmax.f32 %v1354_v0, %v1357_v27  ;;  %v1475_v2 = vrot.slane %v1474_v49, 1 }
 0x1d7   : > { %v2013_v34 = vpop.f32.mrf.mxu1  ;;  %v807_v10 = vmax.f32 %v2314_v17, %v806_v57  ;;  %v1562_v27 = vadd.f32 %v1462_v62, %v763_v44  ;;  %v786_v17 = vrot.slane %v785_v5, 1  ;;  %v798_v44 = vrot.slane %v2329_v48, 1 }
 0x1d8   : > { %v1486_v38 = vmax.f32 %v1484_v11, %v1485_v12  ;;  %v1468_v41 = vrot.slane %v1467_v30, 1  ;;  %v1478_v42 = vrot.slane %v1477_v13, 4 }
 0x1d9   : > { %v1370_v43 = vpop.f32.mrf.mxu1  ;;  %v808_v36 = vrot.slane %v807_v10, 2  ;;  %v787_v54 = vmax.f32 %v785_v5, %v786_v17 }
 0x1da   : > { %v1487_v14 = vrot.slane %v1486_v38, 2  ;;  %v1479_v50 = vmax.f32 %v1477_v13, %v1478_v42  ;;  %v1469_v58 = vmax.f32 %v1467_v30, %v1468_v41  ;;  %v1476_v30 = vmax.f32 %v1474_v49, %v1475_v2 }
 0x1db   : > { %v2014_v51 = vpop.f32.mrf.mxu1  ;;  %v1594_v13 = vsel %vm1593_vm1, %v1562_v27, %v1561_v6  ;;  %v809_v56 = vmax.f32 %v807_v10, %v808_v36  ;;  %v830_v27 = vrot.slane %v2322_v21, 4 }
 0x1dc   : > { %v1498_v55 = vmax.f32 %v2013_v34, %v2014_v51  ;;  %v1480_v59 = vrot.slane %v1479_v50, 2  ;;  %v1488_v3 = vmax.f32 %v1486_v38, %v1487_v14  ;;  %v1563_v11 = vadd.f32 %v1469_v58, %v769_v31 }
 0x1dd   : > { %v1373_v60 = vpop.f32.mrf.mxu1  ;;  %v802_v31 = vrot.slane %v801_v9, 2  ;;  %v1564_v45 = vadd.f32 %v1476_v30, %v2327_v40  ;;  %v819_v14 = vmax.f32 %v2312_v16, %v818_v29  ;;  %v799_v40 = vmax.f32 %v2329_v48, %v798_v44 }
 0x1de   : > { %v1499_v63 = vrot.slane %v1498_v55, 4  ;;  %v1491_v0 = vmax.f32 %v1370_v43, %v1373_v60  ;;  %v1481_v22 = vmax.f32 %v1479_v50, %v1480_v59  ;;  %v1489_v12 = vrot.slane %v1488_v3, 1 }
 0x1df   : > { %v2017_v4 = vpop.f32.mrf.mxu1  ;;  %v1596_v38 = vsel %vm1595_vm2, %v1563_v11, %v1594_v13 }
 0x1e0   : > { %v1500_v7 = vmax.f32 %v1498_v55, %v1499_v63  ;;  %v1492_v8 = vrot.slane %v1491_v0, 4  ;;  %v1482_v23 = vrot.slane %v1481_v22, 1  ;;  %v1490_v46 = vmax.f32 %v1488_v3, %v1489_v12 }
 0x1e1   : > { %v1386_v24 = vpop.f32.mrf.mxu1  ;;  %v803_v55 = vmax.f32 %v801_v9, %v802_v31  ;;  %v1598_v58 = vsel %vm1597_vm3, %v1564_v45, %v1596_v38  ;;  %v814_v63 = vrot.slane %v2332_v53, 2 }
 0x1e2   : > { %v1501_v26 = vrot.slane %v1500_v7, 2  ;;  %v1493_v28 = vmax.f32 %v1491_v0, %v1492_v8  ;;  %v1483_v32 = vmax.f32 %v1481_v22, %v1482_v23  ;;  %v1566_v0 = vadd.f32 %v1490_v46, %v787_v54 }
 0x1e3   : > { %v2018_v33 = vpop.f32.mrf.mxu1  ;;  %v804_v6 = vrot.slane %v803_v55, 1  ;;  %v810_v8 = vrot.slane %v809_v56, 1  ;;  %v815_v13 = vmax.f32 %v2332_v53, %v814_v63 }
 0x1e4   : > { %v1502_v34 = vmax.f32 %v1500_v7, %v1501_v26  ;;  %v1494_v15 = vrot.slane %v1493_v28, 2  ;;  %v1512_v35 = vmax.f32 %v2017_v4, %v2018_v33  ;;  %v1565_v39 = vadd.f32 %v1483_v32, %v781_v25  ;;  %v2358_v33 = vld [vmem:[%s2433_s8] ss:$0 sm:$0xff] }
 0x1e5   : > { %v1389_v37 = vpop.f32.mrf.mxu1  ;;  %v820_v7 = vrot.slane %v819_v14, 2  ;;  %v824_v25 = vrot.slane %v2318_v19, 4  ;;  %v805_v31 = vmax.f32 %v803_v55, %v804_v6 }
 0x1e6   : > { %v1495_v41 = vmax.f32 %v1493_v28, %v1494_v15  ;;  %v1513_v42 = vrot.slane %v1512_v35, 4  ;;  %v1505_v43 = vmax.f32 %v1386_v24, %v1389_v37  ;;  %v1503_v47 = vrot.slane %v1502_v34, 1 }
 0x1e7   : > { %v2021_v49 = vpop.f32.mrf.mxu1  ;;  %v1600_v62 = vsel %vm1599_vm4, %v1565_v39, %v1598_v58  ;;  %v811_v15 = vmax.f32 %v809_v56, %v810_v8  ;;  %v825_v39 = vmax.f32 %v2318_v19, %v824_v25 }
 0x1e8   : > { %v1496_v50 = vrot.slane %v1495_v41, 1  ;;  %v1514_v51 = vmax.f32 %v1512_v35, %v1513_v42  ;;  %v1506_v52 = vrot.slane %v1505_v43, 4  ;;  %v1504_v16 = vmax.f32 %v1502_v34, %v1503_v47 }
 0x1e9   : > { %v1402_v57 = vpop.f32.mrf.mxu1  ;;  %v1602_v10 = vsel %vm1601_vm5, %v1566_v0, %v1600_v62  ;;  %v821_v34 = vmax.f32 %v819_v14, %v820_v7  ;;  %v836_v14 = vrot.slane %v2316_v18, 4 }
 0x1ea   : > { %v1497_v59 = vmax.f32 %v1495_v41, %v1496_v50  ;;  %v1515_v60 = vrot.slane %v1514_v51, 2  ;;  %v1507_v61 = vmax.f32 %v1505_v43, %v1506_v52  ;;  %v1568_v28 = vadd.f32 %v1504_v16, %v799_v40 }
 0x1eb   : > { %v2022_v2 = vpop.f32.mrf.mxu1  ;;  %v831_v41 = vmax.f32 %v2322_v21, %v830_v27  ;;  %v822_v56 = vrot.slane %v821_v34, 1  ;;  %v826_v21 = vrot.slane %v825_v39, 2  ;;  %v837_v40 = vmax.f32 %v2316_v18, %v836_v14 }
 0x1ec   : > { %v1516_v3 = vmax.f32 %v1514_v51, %v1515_v60  ;;  %v1508_v22 = vrot.slane %v1507_v61, 2  ;;  %v1526_v4 = vmax.f32 %v2021_v49, %v2022_v2  ;;  %v1567_v5 = vadd.f32 %v1497_v59, %v2336_v1 }
 0x1ed   : > { %v1405_v9 = vpop.f32.mrf.mxu1  ;;  %v816_v49 = vrot.slane %v815_v13, 1  ;;  %v832_v60 = vrot.slane %v831_v41, 2 }
 0x1ee   : > { %v1517_v11 = vrot.slane %v1516_v3, 1  ;;  %v1509_v23 = vmax.f32 %v1507_v61, %v1508_v22  ;;  %v1527_v24 = vrot.slane %v1526_v4, 4  ;;  %v1519_v48 = vmax.f32 %v1402_v57, %v1405_v9 }
 0x1ef   : > { %v2025_v26 = vpop.f32.mrf.mxu1  ;;  %v1604_v29 = vsel %vm1603_vm6, %v1567_v5, %v1602_v10  ;;  %v842_v57 = vrot.slane %v2320_v20, 4  ;;  %v817_v2 = vmax.f32 %v815_v13, %v816_v49  ;;  %v827_v5 = vmax.f32 %v825_v39, %v826_v21 }
 0x1f0   : > { %v1518_v30 = vmax.f32 %v1516_v3, %v1517_v11  ;;  %v1510_v1 = vrot.slane %v1509_v23, 1  ;;  %v1528_v12 = vmax.f32 %v1526_v4, %v1527_v24  ;;  %v1520_v32 = vrot.slane %v1519_v48, 4 }
 0x1f1   : > { %v1418_v35 = vpop.f32.mrf.mxu1  ;;  %v1606_v17 = vsel %vm1605_vm7, %v1568_v28, %v1604_v29  ;;  %v823_v4 = vmax.f32 %v821_v34, %v822_v56  ;;  %v843_v6 = vmax.f32 %v2320_v20, %v842_v57  ;;  %v833_v9 = vmax.f32 %v831_v41, %v832_v60 }
 0x1f2   : > { %v1511_v36 = vmax.f32 %v1509_v23, %v1510_v1  ;;  %v1529_v37 = vrot.slane %v1528_v12, 2  ;;  %v1521_v38 = vmax.f32 %v1519_v48, %v1520_v32  ;;  %v1570_v42 = vadd.f32 %v1518_v30, %v811_v15 }
 0x1f3   : > { %v2026_v43 = vpop.f32.mrf.mxu1  ;;  %v1627_v44 = vadd.f32 %v2358_v33, %v1606_v17  ;;  %v838_v24 = vrot.slane %v837_v40, 2  ;;  %v828_v30 = vrot.slane %v827_v5, 1  ;;  %v844_v1 = vrot.slane %v843_v6, 2 }
 0x1f4   : > { %v1569_v45 = vadd.f32 %v1511_v36, %v805_v31  ;;  %v1530_v46 = vmax.f32 %v1528_v12, %v1529_v37  ;;  %v1522_v53 = vrot.slane %v1521_v38, 2  ;;  %v1540_v47 = vmax.f32 %v2025_v26, %v2026_v43 }
 0x1f5   : > { %v1629_v50 = vmax.f32 %v1627_v44, 0.0  ;;  %v1421_v51 = vpop.f32.mrf.mxu1  ;;  %v834_v32 = vrot.slane %v833_v9, 1  ;;  %v829_v37 = vmax.f32 %v827_v5, %v828_v30 }
 0x1f6   : > { %v1607_v52 = vsel %vm1593_vm1, %v1570_v42, %v1569_v45  ;;  %v1531_v54 = vrot.slane %v1530_v46, 1  ;;  %v1523_v55 = vmax.f32 %v1521_v38, %v1522_v53  ;;  %v1541_v19 = vrot.slane %v1540_v47, 4 }
 0x1f7   : > { %1631 = vxpose.xlu0.b32.start [1/2] (short) %v1629_v50, 128  ;;  %v1533_v58 = vmax.f32 %v1418_v35, %v1421_v51  ;;  %v2029_v59 = vpop.f32.mrf.mxu1  ;;  %v839_v35 = vmax.f32 %v837_v40, %v838_v24  ;;  %v845_v38 = vmax.f32 %v843_v6, %v844_v1  ;;  %v835_v41 = vmax.f32 %v833_v9, %v834_v32 }
 0x1f8   : > { %v1524_v61 = vrot.slane %v1523_v55, 1  ;;  %v1542_v62 = vmax.f32 %v1540_v47, %v1541_v19  ;;  %v1532_v63 = vmax.f32 %v1530_v46, %v1531_v54 }
 0x1f9   : > { %v1534_v0 = vrot.slane %v1533_v58, 4  ;;  %v1434_v16 = vpop.f32.mrf.mxu1  ;;  %v840_v45 = vrot.slane %v839_v35, 1  ;;  %v846_v49 = vrot.slane %v845_v38, 1 }
 0x1fa   : > { %v1525_v3 = vmax.f32 %v1523_v55, %v1524_v61  ;;  %v1543_v22 = vrot.slane %v1542_v62, 2  ;;  %v1572_v48 = vadd.f32 %v1532_v63, %v823_v4 }
 0x1fb   : > { %v1535_v7 = vmax.f32 %v1533_v58, %v1534_v0  ;;  %v2030_v8 = vpop.f32.mrf.mxu1  ;;  %v841_v54 = vmax.f32 %v839_v35, %v840_v45  ;;  %v847_v19 = vmax.f32 %v845_v38, %v846_v49 }
 0x1fc   : > { %v1571_v10 = vadd.f32 %v1525_v3, %v817_v2  ;;  %v1544_v11 = vmax.f32 %v1542_v62, %v1543_v22  ;;  %v1554_v23 = vmax.f32 %v2029_v59, %v2030_v8 }
 0x1fd   : > { %v1536_v25 = vrot.slane %v1535_v7, 2  ;;  %v1437_v18 = vpop.f32.mrf.mxu1 }
 0x1fe   : > { %v1608_v27 = vsel %vm1595_vm2, %v1571_v10, %v1607_v52  ;;  %v1545_v26 = vrot.slane %v1544_v11, 1  ;;  %v1555_v28 = vrot.slane %v1554_v23, 4  ;;  %v1547_v29 = vmax.f32 %v1434_v16, %v1437_v18 }
 0x1ff   : > { %v1537_v12 = vmax.f32 %v1535_v7, %v1536_v25  ;;  %v1609_v20 = vsel %vm1597_vm3, %v1572_v48, %v1608_v27 }
 0x200   : > { %v1556_v13 = vmax.f32 %v1554_v23, %v1555_v28  ;;  %v1548_v34 = vrot.slane %v1547_v29, 4  ;;  %v1546_v17 = vmax.f32 %v1544_v11, %v1545_v26 }
 0x201   : > { %v1538_v15 = vrot.slane %v1537_v12, 1 }
 0x202   : > { %v1557_v31 = vrot.slane %v1556_v13, 2  ;;  %v1549_v36 = vmax.f32 %v1547_v29, %v1548_v34  ;;  %v1574_v46 = vadd.f32 %v1546_v17, %v835_v41 }
 0x203   : > { %v1539_v39 = vmax.f32 %v1537_v12, %v1538_v15 }
 0x204   : > { %v1558_v42 = vmax.f32 %v1556_v13, %v1557_v31  ;;  %v1550_v43 = vrot.slane %v1549_v36, 2 }
 0x205   : > { %v1573_v44 = vadd.f32 %v1539_v39, %v829_v37 }
 0x206   : > { %v1559_v53 = vrot.slane %v1558_v42, 1  ;;  %v1551_v47 = vmax.f32 %v1549_v36, %v1550_v43 }
 0x207   : > { %v1610_v14 = vsel %vm1599_vm4, %v1573_v44, %v1609_v20 }
 0x208   : > { %v1552_v50 = vrot.slane %v1551_v47, 1  ;;  %v1611_v51 = vsel %vm1601_vm5, %v1574_v46, %v1610_v14  ;;  %v1560_v52 = vmax.f32 %v1558_v42, %v1559_v53 }
 0x20a   : > { %v1553_v55 = vmax.f32 %v1551_v47, %v1552_v50  ;;  %v1576_v21 = vadd.f32 %v1560_v52, %v847_v19 }
 0x20c   : > { %v1575_v56 = vadd.f32 %v1553_v55, %v841_v54 }
 0x20e   : > { %v1612_v57 = vsel %vm1603_vm6, %v1575_v56, %v1611_v51 }
 0x20f   : > { %v1613_v58 = vsel %vm1605_vm7, %v1576_v21, %v1612_v57 }
 0x210   : > { %v1628_v59 = vadd.f32 %v2358_v33, %v1613_v58 }
 0x212   : > { %v1630_v60 = vmax.f32 %v1628_v59, 0.0 }
 0x214   : > { %1632 = vxpose.xlu0.b32.end [2/2] (short) %v1630_v60, 128 }
 0x28c   : > { %v1647_v61 = vpop.trf.xlu0 }
 0x28d   : > { %1663 = vst.msk [vmem:[%s2382_s20] sm:$0xff] %vm477_vm0, %v1647_v61 }
 0x290   : > { %v1648_v33 = vpop.trf.xlu0 }
 0x291   : > { %1664 = vst.msk [vmem:[%s2382_s20 + $0x8] sm:$0xff] %vm477_vm0, %v1648_v33 }
 0x294   : > { %v1649_v62 = vpop.trf.xlu0 }
 0x295   : > { %1665 = vst.msk [vmem:[%s2382_s20 + $0x10] sm:$0xff] %vm477_vm0, %v1649_v62 }
 0x298   : > { %v1650_v40 = vpop.trf.xlu0 }
 0x299   : > { %1666 = vst.msk [vmem:[%s2382_s20 + $0x18] sm:$0xff] %vm477_vm0, %v1650_v40 }
 0x29c   : > { %v1651_v63 = vpop.trf.xlu0 }
 0x29d   : > { %1667 = vst.msk [vmem:[%s2382_s20 + $0x20] sm:$0xff] %vm477_vm0, %v1651_v63 }
 0x2a0   : > { %v1652_v0 = vpop.trf.xlu0 }
 0x2a1   : > { %1668 = vst.msk [vmem:[%s2382_s20 + $0x28] sm:$0xff] %vm477_vm0, %v1652_v0 }
 0x2a4   : > { %v1653_v16 = vpop.trf.xlu0 }
 0x2a5   : > { %1669 = vst.msk [vmem:[%s2382_s20 + $0x30] sm:$0xff] %vm477_vm0, %v1653_v16 }
 0x2a8   : > { %v1654_v2 = vpop.trf.xlu0 }
 0x2a9   : > { %1670 = vst.msk [vmem:[%s2382_s20 + $0x38] sm:$0xff] %vm477_vm0, %v1654_v2 }
 0x2ac   : > { %v1655_v3 = vpop.trf.xlu0 }
 0x2ad   : > { %1671 = vst.msk [vmem:[%s2382_s20 + $0x40] sm:$0xff] %vm477_vm0, %v1655_v3 }
 0x2b0   : > { %v1656_v22 = vpop.trf.xlu0 }
 0x2b1   : > { %1672 = vst.msk [vmem:[%s2382_s20 + $0x48] sm:$0xff] %vm477_vm0, %v1656_v22 }
 0x2b4   : > { %v1657_v4 = vpop.trf.xlu0 }
 0x2b5   : > { %1673 = vst.msk [vmem:[%s2382_s20 + $0x50] sm:$0xff] %vm477_vm0, %v1657_v4 }
 0x2b8   : > { %v1658_v5 = vpop.trf.xlu0 }
 0x2b9   : > { %1674 = vst.msk [vmem:[%s2382_s20 + $0x58] sm:$0xff] %vm477_vm0, %v1658_v5 }
 0x2bc   : > { %v1659_v6 = vpop.trf.xlu0 }
 0x2bd   : > { %1675 = vst.msk [vmem:[%s2382_s20 + $0x60] sm:$0xff] %vm477_vm0, %v1659_v6 }
 0x2c0   : > { %v1660_v7 = vpop.trf.xlu0 }
 0x2c1   : > { %1676 = vst.msk [vmem:[%s2382_s20 + $0x68] sm:$0xff] %vm477_vm0, %v1660_v7 }
 0x2c4   : > { %v1661_v8 = vpop.trf.xlu0 }
 0x2c5   : > { %1677 = vst.msk [vmem:[%s2382_s20 + $0x70] sm:$0xff] %vm477_vm0, %v1661_v8 }
 0x2c8   : > { %v1662_v9 = vpop.trf.xlu0 }
 0x2c9   : > { %1678 = vst.msk [vmem:[%s2382_s20 + $0x78] sm:$0xff] %vm477_vm0, %v1662_v9 }
 0x2ca PF: > { %s19_s11 = sadd.s32 1, %s2106_s11   ;;  %s2435_s30 = smov %s2102_s10 }
 0x2cb   : > { %p16_p5 = scmp.ge.s32.totalorder %s19_s11, 4   ;;  %s2436_s10 = smov %s2438_s12 }
 0x2cd   :  { %18 = sbr.rel (!%p16_p5) target bundleno = 2 (0x2), region = 89 }

</bundles_post_ra>
